<compile_context>
chip_gen: v6e
topology: v6e:2x2x1
jax: 0.10.0
libtpu: 0.0.40
codegen_flags: <defaults>
</compile_context>

<pallas_src>
import jax
import jax.numpy as jnp
from jax import lax
from jax.experimental import pallas as pl
from jax.experimental.pallas import tpu as pltpu

EPS = 1e-12  # F.normalize default eps


# ----------------------------- Pallas kernel ------------------------------- #

def _normed_linear_kernel(x_ref, w_ref, xinv_ref, winv_ref, o_ref, acc_ref):
    # x_ref: (TM, TK) operand tile, w_ref: (TK, TN) operand tile.
    # xinv_ref: (TM, 1) inverse row norms, winv_ref: (1, TN) inverse col norms.
    k = pl.program_id(2)

    @pl.when(k == 0)
    def _():
        acc_ref[...] = jnp.zeros_like(acc_ref)

    acc_ref[...] += jnp.dot(x_ref[...], w_ref[...],
                            preferred_element_type=jnp.float32)

    @pl.when(k == pl.num_programs(2) - 1)
    def _():
        # Scale the f32 accumulator by the precomputed inverse norms
        # (O(TM*TN) VPU work instead of O(TM*K + K*TN) input scaling).
        o_ref[...] = (acc_ref[...] * xinv_ref[...] * winv_ref[...]
                      ).astype(o_ref.dtype)


# ------------------------------- wrapper ------------------------------------ #

def _round_up(v, m):
    return (v + m - 1) // m * m


def _vmem_capacity_bytes(default=64 << 20):
    """Best-effort trace-time VMEM capacity query (conservative fallback)."""
    try:
        info = pltpu.get_tpu_info()
        for name in ("vmem_capacity_bytes", "vmem_size_bytes", "vmem_bytes"):
            v = getattr(info, name, None)
            if v:
                return int(v)
    except Exception:
        pass
    return default


def normed_linear(x, w, *, tm=None, tn=256, tk=512,
                  mxu_dtype=jnp.bfloat16, out_dtype=None,
                  split_for_two_cores=True):
    """out = normalize(x, dim=1) @ normalize(w, dim=0) via a tiled Pallas kernel."""
    M, K = x.shape
    Kw, N = w.shape
    assert K == Kw, (K, Kw)
    out_dtype = out_dtype or x.dtype

    # ---- inverse L2 norms, once, in f32 (removed from the MXU hot loop) ----
    x32 = x.astype(jnp.float32)
    w32 = w.astype(jnp.float32)
    # 1 / max(||.||, eps)  ==  rsqrt(max(sum_sq, eps^2))   (exact identity)
    x_inv = lax.rsqrt(jnp.maximum(jnp.sum(x32 * x32, axis=1, keepdims=True),
                                  EPS * EPS))            # (M, 1) f32
    w_inv = lax.rsqrt(jnp.maximum(jnp.sum(w32 * w32, axis=0, keepdims=True),
                                  EPS * EPS))            # (1, N) f32

    # ---- MXU operands (bf16 by default: native MXU on v6e/v7x, half DMA) ---
    xo = x.astype(mxu_dtype)
    wo = w.astype(mxu_dtype)
    op_bytes = jnp.dtype(mxu_dtype).itemsize
    sub = 16 if op_bytes == 2 else 8        # sublane alignment for op dtype

    # ---- tile sizes ---------------------------------------------------------
    if tm is None:
        # 128-MiB-VMEM chips (v5e/v6e): larger M tiles halve W re-streaming.
        # v7x (64 MiB): keep 256 so K-tiled blocks stay double-buffered.
        tm = 512 if _vmem_capacity_bytes() >= (100 << 20) else 256

    tm_eff = M if M <= tm else tm            # full dim, or multiple of `sub`
    tn_eff = N if N <= tn else tn            # full dim, or multiple of 128
    grid_m = pl.cdiv(M, tm_eff)
    grid_n = pl.cdiv(N, tn_eff)

    # v7x has 2 TensorCores: make sure a "parallel" axis has >= 2 tiles.
    if split_for_two_cores and grid_m * grid_n == 1 and M >= 2 * sub:
        tm_eff = _round_up(pl.cdiv(M, 2), sub)
        grid_m = pl.cdiv(M, tm_eff)

    # ---- K handling: full-K blocks for small K, zero-padded K-tiling else --
    if K > tk:
        tk_eff = tk                          # multiple of 128 -> aligned tiles
        Kp = _round_up(K, tk_eff)
        if Kp != K:
            # Zero K-padding is exact for the dot-product sums.
            # TODO(synk): pad the static weight once outside the hot path.
            xo = jnp.pad(xo, ((0, 0), (0, Kp - K)))
            wo = jnp.pad(wo, ((0, Kp - K), (0, 0)))
    else:
        tk_eff = K
        Kp = K
    grid_k = pl.cdiv(Kp, tk_eff)

    # ---- VMEM budget (double-buffered inputs + output + accumulator) -------
    footprint = (2 * (tm_eff * tk_eff + tk_eff * tn_eff) * op_bytes
                 + 2 * tm_eff * tn_eff * jnp.dtype(out_dtype).itemsize
                 + tm_eff * tn_eff * 4
                 + 4 * (tm_eff + tn_eff) * 4)
    vmem_limit = int(min(100 << 20, max(32 << 20, 2 * footprint)))

    cost = pl.CostEstimate(
        flops=2 * M * K * N,
        transcendentals=0,
        bytes_accessed=int(M * Kp * op_bytes * grid_n
                           + Kp * N * op_bytes * grid_m
                           + M * N * jnp.dtype(out_dtype).itemsize
                           + 4 * (M + N)))

    out = pl.pallas_call(
        _normed_linear_kernel,
        grid=(grid_m, grid_n, grid_k),
        in_specs=[
            pl.BlockSpec((tm_eff, tk_eff), lambda i, j, k: (i, k)),  # x
            pl.BlockSpec((tk_eff, tn_eff), lambda i, j, k: (k, j)),  # w
            pl.BlockSpec((tm_eff, 1),      lambda i, j, k: (i, 0)),  # 1/||x_i||
            pl.BlockSpec((1, tn_eff),      lambda i, j, k: (0, j)),  # 1/||w_j||
        ],
        out_specs=pl.BlockSpec((tm_eff, tn_eff), lambda i, j, k: (i, j)),
        out_shape=jax.ShapeDtypeStruct((M, N), out_dtype),
        scratch_shapes=[pltpu.VMEM((tm_eff, tn_eff), jnp.float32)],
        compiler_params=pltpu.CompilerParams(
            dimension_semantics=("parallel", "parallel", "arbitrary"),
            vmem_limit_bytes=vmem_limit),
        cost_estimate=cost,
    )(xo, wo, x_inv, w_inv)

    return out


# --------------------------- pure-JAX reference ----------------------------- #

def normed_linear_reference(x, w):
    xn = x / jnp.maximum(jnp.linalg.norm(x, axis=1, keepdims=True), EPS)
    wn = w / jnp.maximum(jnp.linalg.norm(w, axis=0, keepdims=True), EPS)
    return xn @ wn


# ---------------------------------- main ------------------------------------ #

if __name__ == "__main__":
    key = jax.random.PRNGKey(0)
    k_x, k_w = jax.random.split(key)

    batch, in_features, out_features = 16, 64, 32

    x = jax.random.normal(k_x, (batch, in_features), jnp.float32)

    # Mimic the PyTorch init (uniform(-1,1).renorm_(2,1,1e-5).mul_(1e5)):
    # columns get (at most) unit L2 norm.  Init is irrelevant to the forward
    # semantics since the forward re-normalizes the columns anyway.
    w = jax.random.uniform(k_w, (in_features, out_features), jnp.float32, -1.0, 1.0)
    w = w / jnp.maximum(jnp.linalg.norm(w, axis=0, keepdims=True), 1e-5)

    ref = jax.block_until_ready(normed_linear_reference(x, w))

    # Exact f32-MXU path: tight check against the f32 reference.
    out_f32 = jax.block_until_ready(normed_linear(x, w, mxu_dtype=jnp.float32))
    assert out_f32.shape == (batch, out_features), out_f32.shape
    assert jnp.allclose(out_f32, ref, atol=1e-5, rtol=1e-5), float(
        jnp.max(jnp.abs(out_f32 - ref)))

    # Default bf16-operand path (v6e/v7x MXU-native): looser tolerance.
    out_bf16 = jax.block_until_ready(normed_linear(x, w))
    assert out_bf16.shape == (batch, out_features), out_bf16.shape
    assert jnp.allclose(out_bf16, ref, atol=2e-2, rtol=2e-2), float(
        jnp.max(jnp.abs(out_bf16 - ref)))

    print("KERNEL_OK")
</pallas_src>

<mosaic_0001>
module attributes {stable_mosaic.version = 11 : i64} {
  func.func @_normed_linear_kernel(%arg0: i32, %arg1: i32, %arg2: i32, %arg3: memref<8x64xf32, #tpu.memory_space<vmem>>, %arg4: memref<64x32xf32, #tpu.memory_space<vmem>>, %arg5: memref<8x1xf32, #tpu.memory_space<vmem>>, %arg6: memref<1x32xf32, #tpu.memory_space<vmem>>, %arg7: memref<8x32xf32, #tpu.memory_space<vmem>>, %arg8: memref<8x32xf32, #tpu.memory_space<vmem>>) attributes {dimension_semantics = [#tpu.dimension_semantics<parallel>, #tpu.dimension_semantics<parallel>, #tpu.dimension_semantics<arbitrary>], iteration_bounds = array<i64: 2, 1, 1>, scalar_prefetch = 0 : i64, scratch_operands = 1 : i64, tpu.core_type = #tpu.core_type<tc>, window_params = [{transform_indices = @transform_0, window_bounds = array<i64: 8, 64>}, {transform_indices = @transform_1, window_bounds = array<i64: 64, 32>}, {transform_indices = @transform_2, window_bounds = array<i64: 8, 1>}, {transform_indices = @transform_3, window_bounds = array<i64: 1, 32>}, {transform_indices = @transform_4, window_bounds = array<i64: 8, 32>}]} {
    %c0_i32 = arith.constant 0 : i32
    %0 = arith.cmpi eq, %arg2, %c0_i32 : i32
    %1 = arith.extui %0 : i1 to i32
    %c0_i32_0 = arith.constant 0 : i32
    %2 = arith.cmpi ne, %1, %c0_i32_0 : i32
    scf.if %2 {
      %cst_10 = arith.constant 0.000000e+00 : f32
      %12 = vector.broadcast %cst_10 : f32 to vector<8x32xf32>
      %c0_11 = arith.constant 0 : index
      %c0_12 = arith.constant 0 : index
      %13 = vector.load %arg8[%c0_11, %c0_12] : memref<8x32xf32, #tpu.memory_space<vmem>>, vector<8x32xf32>
      tpu.vector_store %arg8[%c0_11, %c0_12], %12 {strides = array<i32>} : memref<8x32xf32, #tpu.memory_space<vmem>>, vector<8x32xf32>,
    } else {
    }
    %c0 = arith.constant 0 : index
    %c0_1 = arith.constant 0 : index
    %3 = vector.load %arg8[%c0, %c0_1] : memref<8x32xf32, #tpu.memory_space<vmem>>, vector<8x32xf32>
    %c0_2 = arith.constant 0 : index
    %c0_3 = arith.constant 0 : index
    %4 = vector.load %arg3[%c0_2, %c0_3] : memref<8x64xf32, #tpu.memory_space<vmem>>, vector<8x64xf32>
    %c0_4 = arith.constant 0 : index
    %c0_5 = arith.constant 0 : index
    %5 = vector.load %arg4[%c0_4, %c0_5] : memref<64x32xf32, #tpu.memory_space<vmem>>, vector<64x32xf32>
    %cst = arith.constant dense<0.000000e+00> : vector<8x32xf32>
    %6 = tpu.matmul %4, %5, %cst {dimension_numbers = #tpu.dot_dimension_numbers<[1], [0], [0], [1], [0, 0, 1, 1], [], []>} : vector<8x64xf32>, vector<64x32xf32>, vector<8x32xf32> -> vector<8x32xf32>
    %7 = arith.addf %3, %6 : vector<8x32xf32>
    %c0_6 = arith.constant 0 : index
    %c0_7 = arith.constant 0 : index
    %8 = vector.load %arg8[%c0_6, %c0_7] : memref<8x32xf32, #tpu.memory_space<vmem>>, vector<8x32xf32>
    tpu.vector_store %arg8[%c0_6, %c0_7], %7 {strides = array<i32>} : memref<8x32xf32, #tpu.memory_space<vmem>>, vector<8x32xf32>,
    %c0_i32_8 = arith.constant 0 : i32
    %9 = arith.cmpi eq, %arg2, %c0_i32_8 : i32
    %10 = arith.extui %9 : i1 to i32
    %c0_i32_9 = arith.constant 0 : i32
    %11 = arith.cmpi ne, %10, %c0_i32_9 : i32
    scf.if %11 {
      %c0_10 = arith.constant 0 : index
      %c0_11 = arith.constant 0 : index
      %12 = vector.load %arg8[%c0_10, %c0_11] : memref<8x32xf32, #tpu.memory_space<vmem>>, vector<8x32xf32>
      %c0_12 = arith.constant 0 : index
      %c0_13 = arith.constant 0 : index
      %13 = vector.load %arg5[%c0_12, %c0_13] : memref<8x1xf32, #tpu.memory_space<vmem>>, vector<8x1xf32>
      %14 = vector.broadcast %13 : vector<8x1xf32> to vector<8x32xf32>
      %15 = arith.mulf %12, %14 : vector<8x32xf32>
      %c0_14 = arith.constant 0 : index
      %c0_15 = arith.constant 0 : index
      %16 = vector.load %arg6[%c0_14, %c0_15] : memref<1x32xf32, #tpu.memory_space<vmem>>, vector<1x32xf32>
      %17 = vector.broadcast %16 : vector<1x32xf32> to vector<8x32xf32>
      %18 = arith.mulf %15, %17 : vector<8x32xf32>
      %c0_16 = arith.constant 0 : index
      %c0_17 = arith.constant 0 : index
      %19 = vector.load %arg7[%c0_16, %c0_17] : memref<8x32xf32, #tpu.memory_space<vmem>>, vector<8x32xf32>
      tpu.vector_store %arg7[%c0_16, %c0_17], %18 {strides = array<i32>} : memref<8x32xf32, #tpu.memory_space<vmem>>, vector<8x32xf32>,
    } else {
    }
    return
  }
  func.func @transform_0(%arg0: i32, %arg1: i32, %arg2: i32) -> (i32, i32) {
    %c0_i32 = arith.constant 0 : i32
    return %arg0, %arg2 : i32, i32
  }
  func.func @transform_1(%arg0: i32, %arg1: i32, %arg2: i32) -> (i32, i32) {
    %c0_i32 = arith.constant 0 : i32
    return %arg2, %arg1 : i32, i32
  }
  func.func @transform_2(%arg0: i32, %arg1: i32, %arg2: i32) -> (i32, i32) {
    %c0_i32 = arith.constant 0 : i32
    %c0_i32_0 = arith.constant 0 : i32
    return %arg0, %c0_i32 : i32, i32
  }
  func.func @transform_3(%arg0: i32, %arg1: i32, %arg2: i32) -> (i32, i32) {
    %c0_i32 = arith.constant 0 : i32
    %c0_i32_0 = arith.constant 0 : i32
    return %c0_i32, %arg1 : i32, i32
  }
  func.func @transform_4(%arg0: i32, %arg1: i32, %arg2: i32) -> (i32, i32) {
    %c0_i32 = arith.constant 0 : i32
    return %arg0, %arg1 : i32, i32
  }
}

</mosaic_0001>

<bundles_post_ra>
// kernel: tpu_custom_call.1
= control target key start
LH: loop header
LB: loop body
LE: loop exit
PB: predicated region body
PF: predicated region fallthrough
CT: control target
= control target key end

     0   :  { %9 = vsyncpa [#allocation4], 0  ;;  %s875_s0 = inlined_call_operand.vmem [shape: f32[16,64], index: 0, kind: input, shape index: {}]   ;;  %s876_s1 = inlined_call_operand.vmem [shape: f32[64,32], index: 1, kind: input, shape index: {}]   ;;  %s877_s2 = inlined_call_operand.vmem [shape: f32[16,1], index: 2, kind: input, shape index: {}]   ;;  %s878_s3 = inlined_call_operand.vmem [shape: f32[1,32], index: 3, kind: input, shape index: {}]   ;;  %s879_s4 = inlined_call_operand.hbm [shape: f32[16,32], index: 4, kind: output, shape index: {}]  }
   0x1   :  { %11 = vsyncpa [#allocation4 + $0x1], 0  ;;  %s743_s15 = smov 0   ;;  %s745_s16 = smov 0  }
   0x2   :  { %s747_s17 = smov 0   ;;  %s749_s18 = smov 0  }
   0x3   :  { %s751_s19 = smov 0   ;;  %s753_s20 = smov 0  }
   0x4 LB: > { %s533_s21 = sadd.s32 4294967295, %s712_s20   ;;  %s534_s22 = sadd.s32 4294967294, %s712_s20   ;;  %s712_s20 = sphi %s753_s20, %s17_s20   ;;  %s708_s19 = sphi %s751_s19, %s886_s19   ;;  %s704_s18 = sphi %s749_s18, %s885_s18   ;;  %s700_s17 = sphi %s747_s17, %s884_s17   ;;  %s696_s16 = sphi %s745_s16, %s883_s16   ;;  %s692_s15 = sphi %s743_s15, %s882_s15  }
   0x5   : > { %s36_s23 = sadd.s32 1, %s708_s19  ;;  %s153_s24 = sadd.s32 1, %s700_s17 }
   0x6   : > { %p38_p0 = scmp.ge.s32.totalorder %s36_s23, 2  ;;  %p163_p1 = scmp.ne.s32.totalorder %s700_s17, %s696_s16 }
   0x7   : > { %p164_p2 = scmp.eq.s32.totalorder %s533_s21, 1  ;;  %p169_p3 = scmp.ne.s32.totalorder %s696_s16, %s692_s15 }
   0x8   : > { %s888_s23 = smov (%p38_p0, %s36_s23), 0  ;;  %p170_p5 = scmp.eq.s32.totalorder %s534_s22, 1 }
   0x9   : > { %p783_p4 = por %p164_p2, %p163_p1  ;;  %s148_s26 = ssub.s32 %s708_s19, %s888_s23 }
   0xa   : > { %p539_p6 = scmp.ge.s32.totalorder %s712_s20, 1  ;;  %p151_p7 = scmp.eq.s32.totalorder %s148_s26, 0 }
   0xb   : > { %p790_p8 = por %p170_p5, %p169_p3  ;;  %p223_p9 = scmp.lt.s32.totalorder %s712_s20, 3 }
   0xc   : > { %s796_s28 = scalar_select %p151_p7, %s700_s17, %s153_s24  }
   0xd   : > { %p224_p10 = pnand %p539_p6, %p223_p9 }
   0xe   : > { %p266_p11 = scmp.lt.s32.totalorder (!%p224_p10), %s704_s18, 1  ;;  %s263_s12 = sand.u32 (!%p224_p10), 1, %s696_s16  }
   0xf   : > { %227 = sbr.rel (%p224_p10) target bundleno = 257 (0x101), region = 36  ;;  %s403_s5 = scalar_lea.sflag (!%p224_p10), [#allocation4], %s263_s12 }
  0x14   : > { %v304_v0 = vld [vmem:[%s876_s1 + $0x38] sm:$0xff]  ;;  %v714_v1 = vmov 0.0   ;;  %v303_v2 = vld [vmem:[%s876_s1 + $0x30] sm:$0xff]  ;;  %vm715_vm0 = vmmov 0   ;;  %vm293_vm1 = vcmask 261120   ;;  %s267_s7 = scalar_select %p266_p11, %s704_s18, 1 }
  0x15   : > { %558 = vmatprep.subr.mxu0 %v714_v1  ;;  %574 = vmatprep.mubr.msk.f32.mxu0 %vm715_vm0, %v714_v1  ;;  %v716_v3 = vmov 0   ;;  %294 = vst.msk [vmem:[#allocation2] sm:$0xff] %vm293_vm1, %v714_v1  ;;  %v302_v4 = vld [vmem:[%s876_s1 + $0x28] sm:$0xff]  ;;  %v301_v5 = vld [vmem:[%s876_s1 + $0x20] sm:$0xff]  ;;  %v300_v7 = vld [vmem:[%s876_s1 + $0x18] sm:$0xff]  ;;  %vm305_vm2 = vcmask 523264  }
  0x16   : > { %559 = vmatpush3.msra.mxu0 %v304_v0  ;;  %635 = vset.pattern.permute.xlu0 %v716_v3  ;;  %s541_s10 = sshll.u32 %s267_s7, 3  ;;  %v299_v8 = vld [vmem:[%s876_s1 + $0x10] sm:$0xff]  ;;  %v298_v9 = vld [vmem:[%s876_s1 + $0x8] sm:$0xff]  ;;  %v297_v10 = vld [vmem:[%s876_s1] sm:$0xff]  ;;  %s717_s7 = smov [#allocation3]  }
  0x17   : > { %560 = vmatprep.subr.mxu0 %v714_v1  ;;  %s285_s21 = scalar_lea.vmem %s877_s2, %s541_s10  ;;  %s272_s8 = scalar_lea.vmem %s875_s0, %s541_s10  ;;  %v544_v17 = vld [vmem:[%s878_s3] ss:$0 sm:$0xff] }
  0x18   : > { %561 = vmatpush3.msra.mxu0 %v303_v2  ;;  %v386_v6 = vld [vmem:[%s285_s21] sm:$0xff]  ;;  %s540_s10 = sshll.u32 %s263_s12, 3  ;;  %s546_s21 = sshll.u32 %s704_s18, 7 }
  0x19   : > { %562 = vmatprep.subr.mxu0 %v714_v1  ;;  %389 = vperm.xlu0 %635, %v386_v6   ;;  %v296_v11 = vld [vmem:[%s272_s8] sm:$0xff]  ;;  %s265_s22 = scalar_lea.vmem [#allocation3], %s540_s10  ;;  %s415_s30 = scalar_lea.hbm %s879_s4, %s546_s21 }
  0x1a   : > { %563 = vmatpush3.msra.mxu0 %v302_v4  ;;  %s417_s24 = sshll.u32 %s265_s22, 4  ;;  %s640_s8 = sshll.u32 %s717_s7, 4  ;;  %s418_s24 = int_to_ptr.vmem [resolvable:$true] %s417_s24  ;;  %s641_s8 = int_to_ptr.vmem [resolvable:$false] %s640_s8 }
  0x1b   : > { %564 = vmatprep.subr.mxu0 %v714_v1  ;;  %s636_s6 = scalar_lea.vmem %s418_s24, 128  ;;  %s642_s18 = scalar_lea.vmem %s641_s8, 256 }
  0x1c   : > { %565 = vmatpush3.msra.mxu0 %v301_v5  ;;  %v295_v12 = vld [vmem:[#allocation2] sm:$0xff]  ;;  %p637_p12 = scmp.ne.s32.totalorder %s418_s24, %s636_s6  ;;  %p643_p1 = scmp.lt.s32.totalorder %s418_s24, %s641_s8 }
  0x1d   : > { %566 = vmatprep.subr.mxu0 %v714_v1  ;;  %p644_p2 = scmp.lt.s32.totalorder %s642_s18, %s636_s6 }
  0x1e   : > { %567 = vmatpush3.msra.mxu0 %v300_v7  ;;  %p638_p13 = pnand %p637_p12, %p783_p4 }
  0x1f   : > { %568 = vmatprep.subr.mxu0 %v714_v1  ;;  %p645_p3 = por %p644_p2, %p643_p1 }
  0x20   : > { %569 = vmatpush3.msra.mxu0 %v299_v8  ;;  %p639_p0 = pneg %p638_p13 }
  0x21   : > { %570 = vmatprep.subr.mxu0 %v714_v1 }
  0x22   : > { %571 = vmatpush3.msra.mxu0 %v298_v9  ;;  %p646_p5 = pnand %p645_p3, %p639_p0 }
  0x23   : > { %572 = vmatprep.subr.mxu0 %v714_v1 }
  0x24   : > { %573 = vmatpush3.msra.mxu0 %v297_v10 }
  0x25   : > { %575 = vmatmul.mubr.msk.f32.vlgmr.msra.gmra.mxu0 %vm305_vm2, %v296_v11 }
  0x94   : > { %v390_v16 = vpop.permute.xlu0 %389 }
  0xe5   : > { %v375_v13 = vpop.f32.mrf.mxu0 }
  0xe6   : > { %v379_v14 = vadd.f32 %v375_v13, %v295_v12 }
  0xe7   : > { %v576_v15 = vpop.f32.mrf.mxu0 }
  0xe8   : > { %381 = vst.msk [vmem:[#allocation2] sm:$0xff] %vm293_vm1, %v379_v14 }
  0xef   : > { %v385_v18 = vld [vmem:[#allocation2] sm:$0xff] }
  0xf0   : > { %v392_v19 = vmul.f32 %v390_v16, %v385_v18 }
  0xf2   : > { %v400_v20 = vmul.f32 %v544_v17, %v392_v19 }
  0xf4   : > { %401 = vst.msk [vmem:[%s265_s22] sm:$0xff] %vm293_vm1, %v400_v20 }
  0xf5   : > { %649 = shalt.err (!%p646_p5)
}
  0xf6   : > { %s650_s9 = scalar_lea.hbm %s415_s30, 128  ;;  %s654_s10 = scalar_lea.hbm %s879_s4, 256 }
  0xf7   : > { %p651_p6 = scmp.ne.s32.totalorder %s415_s30, %s650_s9  ;;  %p655_p10 = scmp.lt.s32.totalorder %s415_s30, %s879_s4 }
  0xf8   : > { %p656_p11 = scmp.lt.s32.totalorder %s654_s10, %s650_s9 }
  0xf9   : > { %p652_p7 = pnand %p651_p6, %p783_p4 }
  0xfa   : > { %p657_p12 = por %p656_p11, %p655_p10 }
  0xfb   : > { %p653_p9 = pneg %p652_p7 }
  0xfd   : > { %p658_p13 = pnand %p657_p12, %p653_p9 }
  0xff   : > { %661 = shalt.err (!%p658_p13)
}
 0x100   : > { %577 = dma.vmem_to_hbm [thread:$0]  (%p783_p4), %s418_s24, 128, %s415_s30, %s403_s5  }
 0x101 PF: > { %p583_p0 = scmp.ge.s32.totalorder %s712_s20, 2  ;;  %s429_s21 = sand.u32 1, %s692_s15  }
 0x102   : > { %s430_s22 = scalar_lea.sflag [#allocation4], %s429_s21 }
 0x103   : > { %p580_p1 = pnand %p583_p0, %p790_p8 }
 0x105   : > { %p581_p2 = pneg %p580_p1 }
 0x107   : > { %687 = dma.done.wait (%p581_p2), %s430_s22, 128  }
 0x108   : > { %689 = vsyncadd (%p581_p2), %s430_s22, 4294967168  ;;  %s17_s20 = sadd.s32 1, %s712_s20   ;;  %s882_s15 = smov %s696_s16 }
 0x109   : > { %p14_p3 = scmp.ge.s32.totalorder %s17_s20, 4   ;;  %s883_s16 = smov %s700_s17 }
 0x10a   : > { %s884_s17 = smov %s796_s28  ;;  %s885_s18 = smov %s708_s19 }
 0x10b   : > { %s886_s19 = smov %s888_s23  ;;  %16 = sbr.rel (!%p14_p3) target bundleno = 4 (0x4), region = 88 }
 0x110   :  { %435 = vsyncpa [#allocation4], 1 }
 0x111   :  { %437 = vsyncpa [#allocation4 + $0x1], 1 }

</bundles_post_ra>
